<compile_context>
chip_gen: v5e
topology: v5e:2x2
jax: 0.10.0
libtpu: 0.0.40
codegen_flags: <defaults>
</compile_context>

<pallas_src>
import jax
import jax.numpy as jnp
from jax.experimental import pallas as pl
from jax.experimental.pallas import tpu as pltpu


def mlp_kernel(x_ref, w1_ref, b1_ref, w2_ref, b2_ref, o_ref):
    # Cast the streamed x tile in-kernel (no extra HBM pass in the wrapper);
    # the VPU cast is fully hidden behind the tile DMA.
    x = x_ref[...].astype(w1_ref.dtype)
    # fc1 on the MXU, computed "transposed" so the batch lands on lanes:
    #   (hidden, in) . (tb, in)  [contract the feature axis of both] -> (hidden, tb)
    h = jax.lax.dot_general(
        w1_ref[...], x,
        dimension_numbers=(((1,), (1,)), ((), ())),
        preferred_element_type=jnp.float32,
    )
    # Bias + ReLU on the f32 accumulator (b1 is (hidden, 1), broadcast over lanes).
    h = jnp.maximum(h + b1_ref[...], 0.0)
    # fc2: N=1 matmul would waste the MXU -> VPU multiply + XLU sublane reduce.
    #   (hidden, tb) * (hidden, 1), summed over hidden -> (1, tb)
    out = jnp.sum(h * w2_ref[...], axis=0, keepdims=True)
    out = out + b2_ref[0, 0]  # fc2 bias (scalar, read from SMEM)
    # Sigmoid: exp on the EUP; exact reciprocal for parity with torch.sigmoid.
    o_ref[...] = pl.reciprocal(1.0 + jnp.exp(-out), approx=False).astype(o_ref.dtype)


def _detected_vmem_bytes(default=64 * 1024 * 1024):
    """Physical VMEM per TensorCore (v5e/v6e: 128 MiB, v7x: 64 MiB)."""
    try:
        return int(pltpu.get_tpu_info().vmem_capacity_bytes)
    except Exception:
        return default  # conservative: assume v7x


def _choose_batch_tile(batch, in_dim, hidden, x_itemsize, vmem_budget_bytes):
    """Batch tile (rows per grid step), sized by bytes.

    Per-step VMEM footprint modeled as:
      2 * tb*in_dim*x_itemsize   (double-buffered x stream)
      + 2 * hidden*tb*4          (f32 (hidden, tb) intermediate + temporaries)
      + resident w1/b1/w2.
    Large tiles amortize the ~0.35us per-grid-step overhead; the budget keeps
    the footprint inside the scoped VMEM limit on v5e/v6e/v7x alike.
    """
    if batch <= 1024:
        return batch  # one full-array block (full dims are always legal)

    resident = hidden * in_dim * 2 + hidden * 8 + 4096  # bf16 w1 + f32 b1/w2 + slack
    per_row = 2 * in_dim * x_itemsize + 2 * hidden * 4 + 8
    tb = max(128, (vmem_budget_bytes - resident) // per_row)
    tb = max(128, (min(tb, batch) // 128) * 128)

    # >=2 grid steps so the "parallel" batch axis can shard across TCs, and an
    # even tile count so v7x's 2 TensorCores split the grid without a tail step.
    num_tiles = max(2, pl.cdiv(batch, tb))
    if num_tiles % 2:
        num_tiles += 1
    tb_even = max(128, ((pl.cdiv(batch, num_tiles) + 127) // 128) * 128)
    return min(tb, tb_even)


def feedforward_forward(x, w1, b1, w2, b2, *, param_compute_dtype=jnp.bfloat16, tb=None):
    """Forward pass of FeedforwardNeuralNetModel as a single Pallas kernel.

    Parameters follow the PyTorch layouts:
      x : (B, input_size)          -- streamed in its NATIVE dtype (no wrapper cast)
      w1: (hidden, input_size)     fc1.weight  (cast once to bf16: small, resident)
      b1: (hidden,)                fc1.bias
      w2: (1, hidden)              fc2.weight
      b2: (1,)                     fc2.bias
    Returns a (B, 1) float32 array.

    NOTE: w1 (and x, in-kernel) are rounded to bf16 for the MXU; this is an
    intentional, documented numerics difference vs the f32 PyTorch model.
    """
    B, in_dim = x.shape
    hidden = w1.shape[0]
    assert w1.shape == (hidden, in_dim)
    assert b1.shape == (hidden,)
    assert w2.shape == (1, hidden)
    assert b2.shape == (1,)

    w1_c = w1.astype(param_compute_dtype)                 # small one-time cast
    b1_c = b1.astype(jnp.float32).reshape(hidden, 1)
    w2_c = w2.astype(jnp.float32).reshape(hidden, 1)
    b2_c = b2.astype(jnp.float32).reshape(1, 1)

    x_itemsize = jnp.dtype(x.dtype).itemsize
    vmem_limit = min(_detected_vmem_bytes() // 2, 100 * 1024 * 1024)  # 64 MiB on v5e/v6e, 32 MiB on v7x
    if tb is None:
        tb = _choose_batch_tile(B, in_dim, hidden, x_itemsize, (vmem_limit * 3) // 4)
    tb = int(min(tb, B))
    num_tiles = pl.cdiv(B, tb)

    cost = pl.CostEstimate(
        flops=2 * B * in_dim * hidden + 2 * B * hidden,
        transcendentals=B,
        bytes_accessed=B * in_dim * x_itemsize
        + hidden * in_dim * jnp.dtype(param_compute_dtype).itemsize
        + B * 4,
    )

    out_row = pl.pallas_call(
        mlp_kernel,
        out_shape=jax.ShapeDtypeStruct((1, B), jnp.float32),
        grid_spec=pltpu.PrefetchScalarGridSpec(
            num_scalar_prefetch=0,
            grid=(num_tiles,),
            in_specs=[
                pl.BlockSpec((tb, in_dim), lambda i: (i, 0)),       # x tile (streamed, native dtype)
                pl.BlockSpec((hidden, in_dim), lambda i: (0, 0)),   # fc1 weight (resident)
                pl.BlockSpec((hidden, 1), lambda i: (0, 0)),        # fc1 bias column
                pl.BlockSpec((hidden, 1), lambda i: (0, 0)),        # fc2 weight column
                pl.BlockSpec(memory_space=pltpu.MemorySpace.SMEM),  # fc2 bias scalar
            ],
            out_specs=pl.BlockSpec((1, tb), lambda i: (0, i)),      # lane-dense output row
        ),
        compiler_params=pltpu.CompilerParams(
            dimension_semantics=("parallel",),
            vmem_limit_bytes=int(vmem_limit),
        ),
        cost_estimate=cost,
    )(x, w1_c, b1_c, w2_c, b2_c)

    # (1, B) batch-on-lanes slab -> (B, 1) column (pure layout plumbing).
    return out_row.reshape(B, 1)


def init_params(key, input_size, hidden_size):
    """PyTorch nn.Linear default init: U(-1/sqrt(fan_in), 1/sqrt(fan_in)),
    weights stored in the PyTorch (out_features, in_features) layout."""
    k1, k2, k3, k4 = jax.random.split(key, 4)
    bound1 = 1.0 / jnp.sqrt(jnp.float32(input_size))
    bound2 = 1.0 / jnp.sqrt(jnp.float32(hidden_size))
    w1 = jax.random.uniform(k1, (hidden_size, input_size), jnp.float32, -bound1, bound1)
    b1 = jax.random.uniform(k2, (hidden_size,), jnp.float32, -bound1, bound1)
    w2 = jax.random.uniform(k3, (1, hidden_size), jnp.float32, -bound2, bound2)
    b2 = jax.random.uniform(k4, (1,), jnp.float32, -bound2, bound2)
    return w1, b1, w2, b2


if __name__ == "__main__":
    input_size = 128
    hidden_size = 32
    batch = 8

    key = jax.random.PRNGKey(0)
    kx, kp = jax.random.split(key)
    x = jax.random.normal(kx, (batch, input_size), jnp.float32)
    w1, b1, w2, b2 = init_params(kp, input_size, hidden_size)

    out = feedforward_forward(x, w1, b1, w2, b2)
    out = jax.block_until_ready(out)

    # Pure-JAX reference with the same bf16 rounding of x/w1 and f32 math.
    xb = x.astype(jnp.bfloat16).astype(jnp.float32)
    w1b = w1.astype(jnp.bfloat16).astype(jnp.float32)
    hid = jnp.maximum(xb @ w1b.T + b1[None, :], 0.0)
    ref = jax.nn.sigmoid(hid @ w2.T + b2[None, :])

    assert out.shape == (batch, 1)
    assert jnp.allclose(out, ref, atol=5e-3, rtol=0.0), (
        "max abs diff = %f" % float(jnp.max(jnp.abs(out - ref))))

    print("KERNEL_OK")
</pallas_src>

<mosaic_0001>
module attributes {stable_mosaic.version = 11 : i64} {
  func.func @mlp_kernel(%arg0: i32, %arg1: memref<8x128xf32, #tpu.memory_space<vmem>>, %arg2: memref<32x128xbf16, #tpu.memory_space<vmem>>, %arg3: memref<32x1xf32, #tpu.memory_space<vmem>>, %arg4: memref<32x1xf32, #tpu.memory_space<vmem>>, %arg5: memref<1x1xf32, #tpu.memory_space<smem>>, %arg6: memref<1x8xf32, #tpu.memory_space<vmem>>) attributes {dimension_semantics = [#tpu.dimension_semantics<parallel>], iteration_bounds = array<i64: 1>, scalar_prefetch = 0 : i64, scratch_operands = 0 : i64, tpu.core_type = #tpu.core_type<tc>, window_params = [{transform_indices = @transform_0, window_bounds = array<i64: 8, 128>}, {pipeline_mode = #tpu.pipeline_mode<synchronous>, transform_indices = @transform_1, window_bounds = array<i64: 32, 128>}, {pipeline_mode = #tpu.pipeline_mode<synchronous>, transform_indices = @transform_2, window_bounds = array<i64: 32, 1>}, {pipeline_mode = #tpu.pipeline_mode<synchronous>, transform_indices = @transform_3, window_bounds = array<i64: 32, 1>}, {transform_indices = @transform_4, window_bounds = array<i64: 1, 1>}, {transform_indices = @transform_5, window_bounds = array<i64: 1, 8>}]} {
    %c0 = arith.constant 0 : index
    %c0_0 = arith.constant 0 : index
    %0 = vector.load %arg1[%c0, %c0_0] : memref<8x128xf32, #tpu.memory_space<vmem>>, vector<8x128xf32>
    %1 = arith.truncf %0 : vector<8x128xf32> to vector<8x128xbf16>
    %c0_1 = arith.constant 0 : index
    %c0_2 = arith.constant 0 : index
    %2 = vector.load %arg2[%c0_1, %c0_2] : memref<32x128xbf16, #tpu.memory_space<vmem>>, vector<32x128xbf16>
    %cst = arith.constant dense<0.000000e+00> : vector<32x8xf32>
    %3 = tpu.matmul %2, %1, %cst {dimension_numbers = #tpu.dot_dimension_numbers<[1], [1], [0], [0], [0, 0, 1, 0], [], []>} : vector<32x128xbf16>, vector<8x128xbf16>, vector<32x8xf32> -> vector<32x8xf32>
    %c0_3 = arith.constant 0 : index
    %c0_4 = arith.constant 0 : index
    %4 = vector.load %arg3[%c0_3, %c0_4] : memref<32x1xf32, #tpu.memory_space<vmem>>, vector<32x1xf32>
    %5 = vector.broadcast %4 : vector<32x1xf32> to vector<32x8xf32>
    %6 = arith.addf %3, %5 : vector<32x8xf32>
    %cst_5 = arith.constant 0.000000e+00 : f32
    %7 = vector.broadcast %cst_5 : f32 to vector<32x8xf32>
    %8 = arith.maximumf %6, %7 : vector<32x8xf32>
    %c0_6 = arith.constant 0 : index
    %c0_7 = arith.constant 0 : index
    %9 = vector.load %arg4[%c0_6, %c0_7] : memref<32x1xf32, #tpu.memory_space<vmem>>, vector<32x1xf32>
    %10 = vector.broadcast %9 : vector<32x1xf32> to vector<32x8xf32>
    %11 = arith.mulf %8, %10 : vector<32x8xf32>
    %cst_8 = arith.constant dense<0.000000e+00> : vector<8xf32>
    %12 = vector.multi_reduction <add>, %11, %cst_8 [0] : vector<32x8xf32> to vector<8xf32>
    %13 = vector.shape_cast %12 : vector<8xf32> to vector<1x8xf32>
    %c0_9 = arith.constant 0 : index
    %c0_10 = arith.constant 0 : index
    %14 = memref.load %arg5[%c0_9, %c0_10] : memref<1x1xf32, #tpu.memory_space<smem>>
    %15 = vector.broadcast %14 : f32 to vector<1x8xf32>
    %16 = arith.addf %13, %15 : vector<1x8xf32>
    %cst_11 = arith.constant 0.000000e+00 : f32
    %17 = vector.broadcast %cst_11 : f32 to vector<1x8xf32>
    %18 = arith.subf %17, %16 : vector<1x8xf32>
    %19 = math.exp %18 : vector<1x8xf32>
    %cst_12 = arith.constant 1.000000e+00 : f32
    %20 = vector.broadcast %cst_12 : f32 to vector<1x8xf32>
    %21 = arith.addf %20, %19 : vector<1x8xf32>
    %22 = tpu.reciprocal %21 : vector<1x8xf32> -> vector<1x8xf32>
    %c0_13 = arith.constant 0 : index
    %c0_14 = arith.constant 0 : index
    %23 = vector.load %arg6[%c0_13, %c0_14] : memref<1x8xf32, #tpu.memory_space<vmem>>, vector<1x8xf32>
    tpu.vector_store %arg6[%c0_13, %c0_14], %22 {strides = array<i32>} : memref<1x8xf32, #tpu.memory_space<vmem>>, vector<1x8xf32>,
    return
  }
  func.func @transform_0(%arg0: i32) -> (i32, i32) {
    %c0_i32 = arith.constant 0 : i32
    %c0_i32_0 = arith.constant 0 : i32
    return %arg0, %c0_i32 : i32, i32
  }
  func.func @transform_1(%arg0: i32) -> (i32, i32) {
    %c0_i32 = arith.constant 0 : i32
    %c0_i32_0 = arith.constant 0 : i32
    %c0_i32_1 = arith.constant 0 : i32
    return %c0_i32, %c0_i32_0 : i32, i32
  }
  func.func @transform_2(%arg0: i32) -> (i32, i32) {
    %c0_i32 = arith.constant 0 : i32
    %c0_i32_0 = arith.constant 0 : i32
    %c0_i32_1 = arith.constant 0 : i32
    return %c0_i32, %c0_i32_0 : i32, i32
  }
  func.func @transform_3(%arg0: i32) -> (i32, i32) {
    %c0_i32 = arith.constant 0 : i32
    %c0_i32_0 = arith.constant 0 : i32
    %c0_i32_1 = arith.constant 0 : i32
    return %c0_i32, %c0_i32_0 : i32, i32
  }
  func.func @transform_4(%arg0: i32) -> (i32, i32) {
    %c0_i32 = arith.constant 0 : i32
    %c0_i32_0 = arith.constant 0 : i32
    %c0_i32_1 = arith.constant 0 : i32
    return %c0_i32, %c0_i32_0 : i32, i32
  }
  func.func @transform_5(%arg0: i32) -> (i32, i32) {
    %c0_i32 = arith.constant 0 : i32
    %c0_i32_0 = arith.constant 0 : i32
    return %c0_i32, %arg0 : i32, i32
  }
}

</mosaic_0001>

<bundles_post_ra>
// kernel: tpu_custom_call.1
= control target key start
LH: loop header
LB: loop body
LE: loop exit
PB: predicated region body
PF: predicated region fallthrough
CT: control target
= control target key end

     0   :  { %v215_v3 = vmov 0   ;;  %s286_s0 = inlined_call_operand.vmem [shape: f32[8,128], index: 0, kind: input, shape index: {}]   ;;  %s287_s1 = inlined_call_operand.vmem [shape: bf16[32,128], index: 1, kind: input, shape index: {}]   ;;  %s288_s2 = inlined_call_operand.vmem [shape: f32[32,1], index: 2, kind: input, shape index: {}]   ;;  %s289_s3 = inlined_call_operand.vmem [shape: f32[32,1], index: 3, kind: input, shape index: {}]   ;;  %s290_s4 = inlined_call_operand.<no memory space> [shape: f32[1,1], index: 4, kind: input, shape index: {}]   ;;  %s291_s5 = inlined_call_operand.hbm [shape: f32[1,8], index: 5, kind: output, shape index: {}]  }
   0x1   :  { %v29_v0 = vld [vmem:[%s288_s2] sm:$0xff]  ;;  %v31_v2 = vld [vmem:[%s288_s2 + $0x10] sm:$0xff]  ;;  %182 = vset.pattern.permute.xlu0 %v215_v3  ;;  %183 = vset.pattern.permute.xlu1 %v215_v3 }
   0x2   :  { %v23_v1 = vld [vmem:[%s286_s0] sm:$0xff]  ;;  %35 = vperm.xlu0 %182, %v29_v0   ;;  %45 = vperm.xlu1 %183, %v31_v2  }
   0x3   :  { %v24_v4 = vpack.c.bf16 %v23_v1, %v23_v1  ;;  %v88_v5 = vld [vmem:[%s289_s3] sm:$0xff] }
   0x5   :  { %72 = vmatpush.bf16.xpose.msra.mxu0 %v24_v4  ;;  %179 = vmatpush.bf16.xpose.msra.mxu1 %v24_v4 }
   0x6   :  { %11 = vsyncpa [#allocation4], 0  ;;  %184 = vset.pattern.permute.xlu2 %v215_v3  ;;  %v177_v6 = vld [vmem:[%s287_s1] sm:$0xff]  ;;  %v178_v7 = vld [vmem:[%s287_s1 + $0x8] sm:$0xff]  ;;  %vm116_vm0 = vcmask 64512   ;;  %v131_v49 = vstv %s290_s4  ;;  %s216_s13 = smov [#allocation3]  }
   0x7   :  { %94 = vperm.xlu2 %184, %v88_v5   ;;  %v30_v8 = vld [vmem:[%s288_s2 + $0x8] sm:$0xff]  ;;  %v32_v9 = vld [vmem:[%s288_s2 + $0x18] sm:$0xff]  ;;  %v90_v11 = vld [vmem:[%s289_s3 + $0x10] sm:$0xff]  ;;  %s158_s14 = sshll.u32 %s216_s13, 4  ;;  %s160_s4 = sshll.u32 %s291_s5, 4  ;;  %vm151_vm4 = vcmask 57344   ;;  %s159_s14 = int_to_ptr.vmem [resolvable:$true] %s158_s14  ;;  %s161_s4 = int_to_ptr.hbm [resolvable:$true] %s160_s4 }
   0x8   :  { %v89_v10 = vld [vmem:[%s289_s3 + $0x8] sm:$0xff]  ;;  %v91_v12 = vld [vmem:[%s289_s3 + $0x18] sm:$0xff] }
   0xa   :  { %40 = vperm.xlu0 %182, %v30_v8   ;;  %50 = vperm.xlu1 %183, %v32_v9  }
   0xc   :  { %73 = vmatmul.bf16.vlgmr.msra.gmra.mxu0 %v177_v6  ;;  %78 = vmatmul.bf16.vlgmr.msra.gmra.mxu1 %v178_v7 }
   0xf   :  { %99 = vperm.xlu2 %184, %v89_v10  }
  0x12   :  { %104 = vperm.xlu0 %182, %v90_v11   ;;  %109 = vperm.xlu1 %183, %v91_v12  }
  0x61   :  { %v95_v18 = vpop.permute.xlu2 %94 }
  0x69   :  { %v100_v32 = vpop.permute.xlu2 %99 }
  0x74   :  { %v36_v13 = vpop.permute.xlu0 %35  ;;  %v46_v14 = vpop.permute.xlu1 %45 }
  0x7c   :  { %v41_v17 = vpop.permute.xlu0 %40  ;;  %v51_v20 = vpop.permute.xlu1 %50 }
  0x84   :  { %v105_v31 = vpop.permute.xlu0 %104  ;;  %v110_v35 = vpop.permute.xlu1 %109 }
  0x89   :  { %v74_v15 = vpop.f32.mrf.mxu0  ;;  %v79_v16 = vpop.f32.mrf.mxu1 }
  0x8a   :  { %v75_v19 = vadd.f32 %v74_v15, %v36_v13  ;;  %v80_v21 = vadd.f32 %v79_v16, %v46_v14 }
  0x8c   :  { %v84_v22 = vmax.f32 %v75_v19, 0.0  ;;  %v86_v25 = vmax.f32 %v80_v21, 0.0 }
  0x8e   :  { %v112_v28 = vmul.f32 %v95_v18, %v84_v22  ;;  %v114_v33 = vmul.f32 %v105_v31, %v86_v25 }
  0x90   :  { %v117_v36 = vsel %vm116_vm0, %v112_v28, 0.0  ;;  %v120_v40 = vsel %vm116_vm0, %v114_v33, 0.0 }
  0x91   :  { %v76_v23 = vpop.f32.mrf.mxu0  ;;  %v81_v24 = vpop.f32.mrf.mxu1 }
  0x92   :  { %v77_v26 = vadd.f32 %v76_v23, %v41_v17  ;;  %v82_v27 = vadd.f32 %v81_v24, %v51_v20 }
  0x94   :  { %v85_v29 = vmax.f32 %v77_v26, 0.0  ;;  %v87_v30 = vmax.f32 %v82_v27, 0.0 }
  0x96   :  { %v113_v34 = vmul.f32 %v100_v32, %v85_v29  ;;  %v115_v38 = vmul.f32 %v110_v35, %v87_v30 }
  0x98   :  { %v118_v37 = vsel %vm116_vm0, %v113_v34, 0.0  ;;  %v122_v42 = vsel %vm116_vm0, %v115_v38, 0.0 }
  0x99   :  { %v119_v39 = vadd.f32 %v118_v37, %v117_v36 }
  0x9b   :  { %v121_v41 = vadd.f32 %v120_v40, %v119_v39 }
  0x9d   :  { %v123_v43 = vadd.f32 %v122_v42, %v121_v41 }
  0x9f   :  { %v124_v44 = vrot.slane %v123_v43, 4 }
  0xa1   :  { %v125_v45 = vadd.f32 %v124_v44, %v123_v43 }
  0xa3   :  { %v126_v46 = vrot.slane %v125_v45, 2 }
  0xa5   :  { %v127_v47 = vadd.f32 %v126_v46, %v125_v45 }
  0xa7   :  { %v128_v48 = vrot.slane %v127_v47, 1 }
  0xa9   :  { %v129_v50 = vadd.f32 %v128_v48, %v127_v47 }
  0xab   :  { %v132_v51 = vadd.f32 %v131_v49, %v129_v50 }
  0xad   :  { %v133_v52 = vsub.f32 0.0, %v132_v51 }
  0xaf   :  { %v134_v53 = vmul.f32 1.442695, %v133_v52 }
  0xb1   :  { %185 = vpow2.f32 %v134_v53 }
  0xb7   :  { %v186_v54 = vpop.eup %185 }
  0xb8   :  { %v136_v55 = vadd.f32 1.0, %v186_v54 }
  0xba   :  { %187 = vrcp.f32 %v136_v55  ;;  %v148_v59 = vand.u32 2147483648, %v136_v55  ;;  %v146_v61 = vand.u32 2147483647, %v136_v55  ;;  %vm142_vm2 = vweird.f32 %v136_v55 }
  0xbc   :  { %v149_v63 = vor.u32 1.1754944e-38, %v148_v59  ;;  %vm147_vm5 = vcmp.eq.f32.partialorder %v146_v61, 8.507059e+37 }
  0xc0   :  { %v188_v56 = vpop.eup %187 }
  0xc1   :  { %v138_v57 = vmul.f32 %v188_v56, %v136_v55  ;;  %vm143_vm1 = vweird.f32 %v188_v56 }
  0xc2   :  { %vm144_vm3 = vmor %vm142_vm2, %vm143_vm1 }
  0xc3   :  { %v139_v58 = vsub.f32 1.0, %v138_v57 }
  0xc5   :  { %v140_v60 = vmul.f32 %v188_v56, %v139_v58 }
  0xc7   :  { %v141_v62 = vadd.f32 %v188_v56, %v140_v60 }
  0xc9   :  { %v145_v0 = vsel %vm144_vm3, %v188_v56, %v141_v62 }
  0xca   :  { %v150_v1 = vsel %vm147_vm5, %v149_v63, %v145_v0 }
  0xcb   :  { %152 = vst.msk [vmem:[#allocation3] sm:$0x1] %vm151_vm4, %v150_v1 }
  0xcc   :  { %163 = dma.vmem_to_hbm [thread:$0]  %s159_s14, 16, %s161_s4, [#allocation4]  }
  0xcd   :  { %213 = dma.done.wait [#allocation4], 16  }
  0xce   :  { %214 = vsyncadd [#allocation4], 4294967280 }
  0xcf   :  { %168 = vsyncpa [#allocation4], 1 }

</bundles_post_ra>
